<compile_context>
chip_gen: v6e
topology: v6e:2x2x1
jax: 0.10.0
libtpu: 0.0.40
codegen_flags: <defaults>
</compile_context>

<pallas_src>
import functools
import math

import jax
import jax.numpy as jnp
from jax.experimental import pallas as pl
from jax.experimental.pallas import tpu as pltpu

_PI = 3.14159265358979323846


def _round_up(a, b):
    return (a + b - 1) // b * b


# ---------------------------------------------------------------------------
# atan2 polynomial (Cephes-style): deterministic across environments, ~1e-7
# max abs error, pure VPU/EUP work (free filler in this weight-push-bound kernel).
# ---------------------------------------------------------------------------
def _atan2(y, x):
    ax = jnp.abs(x)
    ay = jnp.abs(y)
    mx = jnp.maximum(ax, ay)
    mn = jnp.minimum(ax, ay)
    r = mn / jnp.maximum(mx, jnp.float32(1e-30))          # r in [0, 1]
    # second range reduction: r -> z in [-tan(pi/8), tan(pi/8)]
    big = r > jnp.float32(0.4142135623730951)
    z = jnp.where(big, (r - 1.0) / (r + 1.0), r)
    s = z * z
    p = jnp.float32(8.05374449538e-2)
    p = p * s - jnp.float32(1.38776856032e-1)
    p = p * s + jnp.float32(1.99777106478e-1)
    p = p * s - jnp.float32(3.33329491539e-1)
    a = p * s * z + z
    a = a + jnp.where(big, jnp.float32(_PI / 4), jnp.float32(0.0))
    # octant reconstruction
    a = jnp.where(ay > ax, jnp.float32(_PI / 2) - a, a)
    a = jnp.where(x < 0, jnp.float32(_PI) - a, a)
    a = jnp.where(y < 0, -a, a)
    return a


# ---------------------------------------------------------------------------
# Kernel
# ---------------------------------------------------------------------------
def sff_kernel(
    x_ref,                      # [TB, C*T]        f32 activations
    w1f_ref, b1f_ref,           # fused stage-1:   [CT, MT+2CT] bf16, [1, MT+2CT] f32
    ws2_ref, bs2_ref,           # spatial conv2:   [MT, CT] bf16,     [1, CT] f32
    wpa1_ref, bpa1_ref,         # bdiag(pha1,amp1):[2CT, 2MT] bf16,   [1, 2MT] f32
    wpa2_ref, bpa2_ref,         # bdiag(pha2,amp2):[2MT, 2CT] bf16,   [1, 2CT] f32
    finv_ref,                   # fused inv DFT:   [2CT, 2CT] bf16
    o_ref,                      # [TB, round_up(CT,128)] f32
    *, C, T, mid,
):
    f32 = jnp.float32
    bf16 = jnp.bfloat16
    CT = C * T
    MT = mid * T

    x = x_ref[...]                                   # [TB, CT] f32
    xb = x.astype(bf16)

    # ---- fused stage 1: [spatial conv1 | forward-DFT real | forward-DFT imag]
    s1 = jnp.dot(xb, w1f_ref[...], preferred_element_type=f32) + b1f_ref[...]
    h_spa = jnp.maximum(s1[:, :MT], 0.0)             # ReLU(conv1(x))
    re = s1[:, MT:MT + CT]                           # Re(fft(x))
    im = s1[:, MT + CT:]                             # Im(fft(x))

    # ---- spatial flow, second conv ----------------------------------------
    spa = jnp.dot(h_spa.astype(bf16), ws2_ref[...],
                  preferred_element_type=f32) + bs2_ref[...]

    # ---- amplitude / phase --------------------------------------------------
    amp = jnp.sqrt(re * re + im * im)
    phase = _atan2(im, re)

    # ---- fused phase/amp conv-relu-conv (block-diagonal weights) ------------
    pa = jnp.concatenate([phase, amp], axis=1)       # [TB, 2CT] (lane-dense 128)
    h = jnp.dot(pa.astype(bf16), wpa1_ref[...],
                preferred_element_type=f32) + bpa1_ref[...]
    h = jnp.maximum(h, 0.0)                          # [TB, 2MT]
    pa2 = jnp.dot(h.astype(bf16), wpa2_ref[...],
                  preferred_element_type=f32) + bpa2_ref[...]
    rph = pa2[:, :CT]                                # refined phase
    ram = pa2[:, CT:]                                # refined amplitude

    # ---- complex reconstruction + fused inverse DFT -------------------------
    real = ram * jnp.cos(rph)
    imag = ram * jnp.sin(rph)
    ri = jnp.concatenate([real, imag], axis=1)       # [TB, 2CT]
    y = jnp.dot(ri.astype(bf16), finv_ref[...], preferred_element_type=f32)
    y_re = y[:, :CT]
    y_im = y[:, CT:]
    fre = jnp.sqrt(y_re * y_re + y_im * y_im)        # abs(ifft(...))

    # ---- combine: Spa + Fre + x; pad minor dim to 128 for an unmasked store -
    res = spa + fre + x
    pad = o_ref.shape[1] - CT
    if pad > 0:
        res = jnp.concatenate(
            [res, jnp.zeros((res.shape[0], pad), f32)], axis=1)
    o_ref[...] = res


# ---------------------------------------------------------------------------
# Weight / DFT matrix construction (run ONCE per parameter set, not per step)
# ---------------------------------------------------------------------------
def conv1d_to_matrix(w, T):
    """w: [O, Cin, K] -> banded [Cin*T, O*T] matrix for 'same' Conv1d (odd K)."""
    O, Cin, K = w.shape
    if K % 2 == 0:
        raise ValueError("Only odd kernel sizes keep length T with padding=K//2.")
    pad = K // 2
    s = jnp.arange(T)[:, None]          # input position  (row)
    t = jnp.arange(T)[None, :]          # output position (col)
    d = s - t + pad                     # tap index j = s - t + pad
    valid = ((d >= 0) & (d < K)).astype(w.dtype)
    dcl = jnp.clip(d, 0, K - 1)
    band = w[:, :, dcl] * valid[None, None]          # [O, Cin, T, T]
    return jnp.transpose(band, (1, 2, 0, 3)).reshape(Cin * T, O * T)


def bias_to_row(b, T):
    """b: [O] -> [1, O*T] broadcast row (channel-major flat layout)."""
    return jnp.repeat(b, T)[None, :].astype(jnp.float32)


def _block_diag2(a, b):
    za = jnp.zeros((a.shape[0], b.shape[1]), a.dtype)
    zb = jnp.zeros((b.shape[0], a.shape[1]), a.dtype)
    return jnp.concatenate(
        [jnp.concatenate([a, za], axis=1),
         jnp.concatenate([zb, b], axis=1)], axis=0)


def build_sff_operands(params, C, T, mid):
    """Fold Conv1d + FFT/IFFT into fused bf16 matmul operands (built once)."""
    CT = C * T
    bf16 = jnp.bfloat16

    ws1, bs1, ws2, bs2 = params["spa"]
    wp1, bp1, wp2, bp2 = params["pha"]
    wa1, ba1, wa2, ba2 = params["amp"]

    # per-channel DFT blocks (block-diagonal over channels).
    n = jnp.arange(T, dtype=jnp.float32)
    theta = 2.0 * jnp.float32(_PI) * jnp.outer(n, n) / T
    eye = jnp.eye(C, dtype=jnp.float32)
    cblk = jnp.kron(eye, jnp.cos(theta))             # [CT, CT]
    sblk = jnp.kron(eye, jnp.sin(theta))             # [CT, CT]

    ws1b = conv1d_to_matrix(ws1, T)                  # [CT, MT]
    ws2b = conv1d_to_matrix(ws2, T)                  # [MT, CT]
    wp1b = conv1d_to_matrix(wp1, T)
    wa1b = conv1d_to_matrix(wa1, T)
    wp2b = conv1d_to_matrix(wp2, T)
    wa2b = conv1d_to_matrix(wa2, T)

    # fused stage-1 RHS: x @ [Ws1 | C | -S] -> [h_spa | re | im]
    w1f = jnp.concatenate([ws1b, cblk, -sblk], axis=1).astype(bf16)
    b1f = jnp.concatenate(
        [bias_to_row(bs1, T), jnp.zeros((1, 2 * CT), jnp.float32)], axis=1)

    # fused phase/amp conv stacks via block-diagonal weights.
    wpa1 = _block_diag2(wp1b, wa1b).astype(bf16)     # [2CT, 2MT]
    bpa1 = jnp.concatenate([bias_to_row(bp1, T), bias_to_row(ba1, T)], axis=1)
    wpa2 = _block_diag2(wp2b, wa2b).astype(bf16)     # [2MT, 2CT]
    bpa2 = jnp.concatenate([bias_to_row(bp2, T), bias_to_row(ba2, T)], axis=1)

    # fused inverse DFT (norm='backward'): [real|imag] @ [[C,S],[-S,C]]/T.
    finv = (jnp.concatenate(
        [jnp.concatenate([cblk, sblk], axis=1),
         jnp.concatenate([-sblk, cblk], axis=1)], axis=0)
        / jnp.float32(T)).astype(bf16)

    return (w1f, b1f, ws2b.astype(bf16), bias_to_row(bs2, T),
            wpa1, bpa1, wpa2, bpa2, finv)


# ---------------------------------------------------------------------------
# Forward wrapper
# ---------------------------------------------------------------------------
def sff_block_forward(x, ops, *, C, T, mid, tile_b=None):
    """x: [B, C, T] (NCW, same as the PyTorch module). ops: build_sff_operands()."""
    B = x.shape[0]
    CT = C * T
    if tile_b is None:
        tile_b = min(_round_up(B, 8), 128)   # >=8 sublanes; raise toward 128/256 for big B
    B_pad = _round_up(B, tile_b)
    out_w = _round_up(CT, 128)               # lane-dense output width

    x_flat = x.reshape(B, CT).astype(jnp.float32)
    if B_pad != B:
        x_flat = jnp.pad(x_flat, ((0, B_pad - B), (0, 0)))

    def const_spec(arr):
        return pl.BlockSpec(arr.shape, lambda i: (0, 0))

    in_specs = ([pl.BlockSpec((tile_b, CT), lambda i: (i, 0))]
                + [const_spec(o) for o in ops])
    out_spec = pl.BlockSpec((tile_b, out_w), lambda i: (i, 0))

    # explicit VMEM budget: resident weights + double-buffered x/out, with headroom.
    resident = sum(int(o.size) * o.dtype.itemsize for o in ops)
    streamed = 2 * (tile_b * CT * 4 + tile_b * out_w * 4)
    vmem_bytes = int(min(max(4 * (resident + streamed), 8 << 20), 96 << 20))

    out = pl.pallas_call(
        functools.partial(sff_kernel, C=C, T=T, mid=mid),
        out_shape=jax.ShapeDtypeStruct((B_pad, out_w), jnp.float32),
        grid=(B_pad // tile_b,),
        in_specs=in_specs,
        out_specs=out_spec,
        compiler_params=pltpu.CompilerParams(
            dimension_semantics=("parallel",),   # v7x: shard batch over both TCs
            vmem_limit_bytes=vmem_bytes),
    )(x_flat, *ops)

    return out[:B, :CT].reshape(B, C, T)


# ---------------------------------------------------------------------------
# Deterministic parameter init (mimics PyTorch Conv1d uniform(-1/sqrt(fan_in)))
# ---------------------------------------------------------------------------
def init_conv1d(key, out_c, in_c, k):
    kw, kb = jax.random.split(key)
    bound = 1.0 / math.sqrt(in_c * k)
    w = jax.random.uniform(kw, (out_c, in_c, k), jnp.float32, -bound, bound)
    b = jax.random.uniform(kb, (out_c,), jnp.float32, -bound, bound)
    return w, b


if __name__ == "__main__":
    # SFFBlock(window_size=16, feature_num=4, mid_channel=8, spa_ks=3, fre_ks=3,
    #          fus_ks=*, r=*, fb=False, sf=True, ff=True)
    # TODO(synk): the fb=True path uses SpatialAttention/ChannelAttention which
    # are not defined in the reference source, so the fusion branch is omitted.
    B, C, T = 2, 4, 16
    mid = 8
    spa_ks = fre_ks = 3

    key = jax.random.PRNGKey(0)
    keys = jax.random.split(key, 7)
    x = jax.random.normal(keys[0], (B, C, T), jnp.float32)

    ws1, bs1 = init_conv1d(keys[1], mid, C, spa_ks)
    ws2, bs2 = init_conv1d(keys[2], C, mid, spa_ks)
    wp1, bp1 = init_conv1d(keys[3], mid, C, fre_ks)
    wp2, bp2 = init_conv1d(keys[4], C, mid, fre_ks)
    wa1, ba1 = init_conv1d(keys[5], mid, C, fre_ks)
    wa2, ba2 = init_conv1d(keys[6], C, mid, fre_ks)

    params = {
        "spa": (ws1, bs1, ws2, bs2),
        "pha": (wp1, bp1, wp2, bp2),
        "amp": (wa1, ba1, wa2, ba2),
    }

    # Build fused matmul operands ONCE (hoisted out of the per-forward path).
    ops = build_sff_operands(params, C, T, mid)

    fwd = jax.jit(functools.partial(sff_block_forward, C=C, T=T, mid=mid))
    out = fwd(x, ops)
    jax.block_until_ready(out)
    assert out.shape == (B, C, T) and out.dtype == jnp.float32
    print("KERNEL_OK")
</pallas_src>

<mosaic_0001>
module attributes {stable_mosaic.version = 11 : i64} {
  func.func @sff_kernel(%arg0: i32, %arg1: memref<8x64xf32, #tpu.memory_space<vmem>>, %arg2: memref<64x256xbf16, #tpu.memory_space<vmem>>, %arg3: memref<1x256xf32, #tpu.memory_space<vmem>>, %arg4: memref<128x64xbf16, #tpu.memory_space<vmem>>, %arg5: memref<1x64xf32, #tpu.memory_space<vmem>>, %arg6: memref<128x256xbf16, #tpu.memory_space<vmem>>, %arg7: memref<1x256xf32, #tpu.memory_space<vmem>>, %arg8: memref<256x128xbf16, #tpu.memory_space<vmem>>, %arg9: memref<1x128xf32, #tpu.memory_space<vmem>>, %arg10: memref<128x128xbf16, #tpu.memory_space<vmem>>, %arg11: memref<8x128xf32, #tpu.memory_space<vmem>>) attributes {dimension_semantics = [#tpu.dimension_semantics<parallel>], iteration_bounds = array<i64: 1>, scalar_prefetch = 0 : i64, scratch_operands = 0 : i64, tpu.core_type = #tpu.core_type<tc>, window_params = [{transform_indices = @transform_0, window_bounds = array<i64: 8, 64>}, {pipeline_mode = #tpu.pipeline_mode<synchronous>, transform_indices = @transform_1, window_bounds = array<i64: 64, 256>}, {pipeline_mode = #tpu.pipeline_mode<synchronous>, transform_indices = @transform_2, window_bounds = array<i64: 1, 256>}, {pipeline_mode = #tpu.pipeline_mode<synchronous>, transform_indices = @transform_3, window_bounds = array<i64: 128, 64>}, {pipeline_mode = #tpu.pipeline_mode<synchronous>, transform_indices = @transform_4, window_bounds = array<i64: 1, 64>}, {pipeline_mode = #tpu.pipeline_mode<synchronous>, transform_indices = @transform_5, window_bounds = array<i64: 128, 256>}, {pipeline_mode = #tpu.pipeline_mode<synchronous>, transform_indices = @transform_6, window_bounds = array<i64: 1, 256>}, {pipeline_mode = #tpu.pipeline_mode<synchronous>, transform_indices = @transform_7, window_bounds = array<i64: 256, 128>}, {pipeline_mode = #tpu.pipeline_mode<synchronous>, transform_indices = @transform_8, window_bounds = array<i64: 1, 128>}, {pipeline_mode = #tpu.pipeline_mode<synchronous>, transform_indices = @transform_9, window_bounds = array<i64: 128, 128>}, {transform_indices = @transform_10, window_bounds = array<i64: 8, 128>}]} {
    %c0 = arith.constant 0 : index
    %c0_0 = arith.constant 0 : index
    %0 = vector.load %arg1[%c0, %c0_0] : memref<8x64xf32, #tpu.memory_space<vmem>>, vector<8x64xf32>
    %1 = arith.truncf %0 : vector<8x64xf32> to vector<8x64xbf16>
    %c0_1 = arith.constant 0 : index
    %c0_2 = arith.constant 0 : index
    %2 = vector.load %arg2[%c0_1, %c0_2] : memref<64x256xbf16, #tpu.memory_space<vmem>>, vector<64x256xbf16>
    %cst = arith.constant dense<0.000000e+00> : vector<8x256xf32>
    %3 = tpu.matmul %1, %2, %cst {dimension_numbers = #tpu.dot_dimension_numbers<[1], [0], [0], [1], [0, 0, 1, 1], [], []>} : vector<8x64xbf16>, vector<64x256xbf16>, vector<8x256xf32> -> vector<8x256xf32>
    %c0_3 = arith.constant 0 : index
    %c0_4 = arith.constant 0 : index
    %4 = vector.load %arg3[%c0_3, %c0_4] : memref<1x256xf32, #tpu.memory_space<vmem>>, vector<1x256xf32>
    %5 = vector.broadcast %4 : vector<1x256xf32> to vector<8x256xf32>
    %6 = arith.addf %3, %5 : vector<8x256xf32>
    %7 = vector.extract_strided_slice %6 {offsets = [0, 0], sizes = [8, 128], strides = [1, 1]} : vector<8x256xf32> to vector<8x128xf32>
    %cst_5 = arith.constant 0.000000e+00 : f32
    %8 = vector.broadcast %cst_5 : f32 to vector<8x128xf32>
    %9 = arith.maximumf %7, %8 : vector<8x128xf32>
    %10 = vector.extract_strided_slice %6 {offsets = [0, 128], sizes = [8, 64], strides = [1, 1]} : vector<8x256xf32> to vector<8x64xf32>
    %11 = vector.extract_strided_slice %6 {offsets = [0, 192], sizes = [8, 64], strides = [1, 1]} : vector<8x256xf32> to vector<8x64xf32>
    %12 = arith.truncf %9 : vector<8x128xf32> to vector<8x128xbf16>
    %c0_6 = arith.constant 0 : index
    %c0_7 = arith.constant 0 : index
    %13 = vector.load %arg4[%c0_6, %c0_7] : memref<128x64xbf16, #tpu.memory_space<vmem>>, vector<128x64xbf16>
    %cst_8 = arith.constant dense<0.000000e+00> : vector<8x64xf32>
    %14 = tpu.matmul %12, %13, %cst_8 {dimension_numbers = #tpu.dot_dimension_numbers<[1], [0], [0], [1], [0, 0, 1, 1], [], []>} : vector<8x128xbf16>, vector<128x64xbf16>, vector<8x64xf32> -> vector<8x64xf32>
    %c0_9 = arith.constant 0 : index
    %c0_10 = arith.constant 0 : index
    %15 = vector.load %arg5[%c0_9, %c0_10] : memref<1x64xf32, #tpu.memory_space<vmem>>, vector<1x64xf32>
    %16 = vector.broadcast %15 : vector<1x64xf32> to vector<8x64xf32>
    %17 = arith.addf %14, %16 : vector<8x64xf32>
    %18 = arith.mulf %10, %10 : vector<8x64xf32>
    %19 = arith.mulf %11, %11 : vector<8x64xf32>
    %20 = arith.addf %18, %19 : vector<8x64xf32>
    %21 = math.sqrt %20 : vector<8x64xf32>
    %22 = math.absf %10 : vector<8x64xf32>
    %23 = math.absf %11 : vector<8x64xf32>
    %24 = arith.maximumf %22, %23 : vector<8x64xf32>
    %25 = arith.minimumf %22, %23 : vector<8x64xf32>
    %cst_11 = arith.constant 1.000000e-30 : f32
    %26 = vector.broadcast %cst_11 : f32 to vector<8x64xf32>
    %27 = arith.maximumf %24, %26 : vector<8x64xf32>
    %28 = arith.divf %25, %27 : vector<8x64xf32>
    %cst_12 = arith.constant 0.414213568 : f32
    %29 = vector.broadcast %cst_12 : f32 to vector<8x64xf32>
    %30 = arith.cmpf ogt, %28, %29 : vector<8x64xf32>
    %cst_13 = arith.constant 1.000000e+00 : f32
    %31 = vector.broadcast %cst_13 : f32 to vector<8x64xf32>
    %32 = arith.subf %28, %31 : vector<8x64xf32>
    %cst_14 = arith.constant 1.000000e+00 : f32
    %33 = vector.broadcast %cst_14 : f32 to vector<8x64xf32>
    %34 = arith.addf %28, %33 : vector<8x64xf32>
    %35 = arith.divf %32, %34 : vector<8x64xf32>
    %36 = arith.select %30, %35, %28 : vector<8x64xi1>, vector<8x64xf32>
    %37 = arith.mulf %36, %36 : vector<8x64xf32>
    %cst_15 = arith.constant 0.0805374458 : f32
    %38 = vector.broadcast %cst_15 : f32 to vector<8x64xf32>
    %39 = arith.mulf %38, %37 : vector<8x64xf32>
    %cst_16 = arith.constant 0.138776854 : f32
    %40 = vector.broadcast %cst_16 : f32 to vector<8x64xf32>
    %41 = arith.subf %39, %40 : vector<8x64xf32>
    %42 = arith.mulf %41, %37 : vector<8x64xf32>
    %cst_17 = arith.constant 0.199777111 : f32
    %43 = vector.broadcast %cst_17 : f32 to vector<8x64xf32>
    %44 = arith.addf %42, %43 : vector<8x64xf32>
    %45 = arith.mulf %44, %37 : vector<8x64xf32>
    %cst_18 = arith.constant 0.333329499 : f32
    %46 = vector.broadcast %cst_18 : f32 to vector<8x64xf32>
    %47 = arith.subf %45, %46 : vector<8x64xf32>
    %48 = arith.mulf %47, %37 : vector<8x64xf32>
    %49 = arith.mulf %48, %36 : vector<8x64xf32>
    %50 = arith.addf %49, %36 : vector<8x64xf32>
    %cst_19 = arith.constant 0.785398185 : f32
    %cst_20 = arith.constant 0.000000e+00 : f32
    %51 = vector.broadcast %cst_19 : f32 to vector<8x64xf32>
    %52 = vector.broadcast %cst_20 : f32 to vector<8x64xf32>
    %53 = arith.select %30, %51, %52 : vector<8x64xi1>, vector<8x64xf32>
    %54 = arith.addf %50, %53 : vector<8x64xf32>
    %55 = arith.cmpf ogt, %23, %22 : vector<8x64xf32>
    %cst_21 = arith.constant 1.57079637 : f32
    %56 = vector.broadcast %cst_21 : f32 to vector<8x64xf32>
    %57 = arith.subf %56, %54 : vector<8x64xf32>
    %58 = arith.select %55, %57, %54 : vector<8x64xi1>, vector<8x64xf32>
    %cst_22 = arith.constant 0.000000e+00 : f32
    %59 = vector.broadcast %cst_22 : f32 to vector<8x64xf32>
    %60 = arith.cmpf olt, %10, %59 : vector<8x64xf32>
    %cst_23 = arith.constant 3.14159274 : f32
    %61 = vector.broadcast %cst_23 : f32 to vector<8x64xf32>
    %62 = arith.subf %61, %58 : vector<8x64xf32>
    %63 = arith.select %60, %62, %58 : vector<8x64xi1>, vector<8x64xf32>
    %cst_24 = arith.constant 0.000000e+00 : f32
    %64 = vector.broadcast %cst_24 : f32 to vector<8x64xf32>
    %65 = arith.cmpf olt, %11, %64 : vector<8x64xf32>
    %cst_25 = arith.constant 0.000000e+00 : f32
    %66 = vector.broadcast %cst_25 : f32 to vector<8x64xf32>
    %67 = arith.subf %66, %63 : vector<8x64xf32>
    %68 = arith.select %65, %67, %63 : vector<8x64xi1>, vector<8x64xf32>
    %69 = tpu.concatenate %68, %21 in 1 : vector<8x64xf32>, vector<8x64xf32> -> vector<8x128xf32>
    %70 = arith.truncf %69 : vector<8x128xf32> to vector<8x128xbf16>
    %c0_26 = arith.constant 0 : index
    %c0_27 = arith.constant 0 : index
    %71 = vector.load %arg6[%c0_26, %c0_27] : memref<128x256xbf16, #tpu.memory_space<vmem>>, vector<128x256xbf16>
    %cst_28 = arith.constant dense<0.000000e+00> : vector<8x256xf32>
    %72 = tpu.matmul %70, %71, %cst_28 {dimension_numbers = #tpu.dot_dimension_numbers<[1], [0], [0], [1], [0, 0, 1, 1], [], []>} : vector<8x128xbf16>, vector<128x256xbf16>, vector<8x256xf32> -> vector<8x256xf32>
    %c0_29 = arith.constant 0 : index
    %c0_30 = arith.constant 0 : index
    %73 = vector.load %arg7[%c0_29, %c0_30] : memref<1x256xf32, #tpu.memory_space<vmem>>, vector<1x256xf32>
    %74 = vector.broadcast %73 : vector<1x256xf32> to vector<8x256xf32>
    %75 = arith.addf %72, %74 : vector<8x256xf32>
    %cst_31 = arith.constant 0.000000e+00 : f32
    %76 = vector.broadcast %cst_31 : f32 to vector<8x256xf32>
    %77 = arith.maximumf %75, %76 : vector<8x256xf32>
    %78 = arith.truncf %77 : vector<8x256xf32> to vector<8x256xbf16>
    %c0_32 = arith.constant 0 : index
    %c0_33 = arith.constant 0 : index
    %79 = vector.load %arg8[%c0_32, %c0_33] : memref<256x128xbf16, #tpu.memory_space<vmem>>, vector<256x128xbf16>
    %cst_34 = arith.constant dense<0.000000e+00> : vector<8x128xf32>
    %80 = tpu.matmul %78, %79, %cst_34 {dimension_numbers = #tpu.dot_dimension_numbers<[1], [0], [0], [1], [0, 0, 1, 1], [], []>} : vector<8x256xbf16>, vector<256x128xbf16>, vector<8x128xf32> -> vector<8x128xf32>
    %c0_35 = arith.constant 0 : index
    %c0_36 = arith.constant 0 : index
    %81 = vector.load %arg9[%c0_35, %c0_36] : memref<1x128xf32, #tpu.memory_space<vmem>>, vector<1x128xf32>
    %82 = vector.broadcast %81 : vector<1x128xf32> to vector<8x128xf32>
    %83 = arith.addf %80, %82 : vector<8x128xf32>
    %84 = vector.extract_strided_slice %83 {offsets = [0, 0], sizes = [8, 64], strides = [1, 1]} : vector<8x128xf32> to vector<8x64xf32>
    %85 = vector.extract_strided_slice %83 {offsets = [0, 64], sizes = [8, 64], strides = [1, 1]} : vector<8x128xf32> to vector<8x64xf32>
    %86 = math.cos %84 : vector<8x64xf32>
    %87 = arith.mulf %85, %86 : vector<8x64xf32>
    %88 = math.sin %84 : vector<8x64xf32>
    %89 = arith.mulf %85, %88 : vector<8x64xf32>
    %90 = tpu.concatenate %87, %89 in 1 : vector<8x64xf32>, vector<8x64xf32> -> vector<8x128xf32>
    %91 = arith.truncf %90 : vector<8x128xf32> to vector<8x128xbf16>
    %c0_37 = arith.constant 0 : index
    %c0_38 = arith.constant 0 : index
    %92 = vector.load %arg10[%c0_37, %c0_38] : memref<128x128xbf16, #tpu.memory_space<vmem>>, vector<128x128xbf16>
    %cst_39 = arith.constant dense<0.000000e+00> : vector<8x128xf32>
    %93 = tpu.matmul %91, %92, %cst_39 {dimension_numbers = #tpu.dot_dimension_numbers<[1], [0], [0], [1], [0, 0, 1, 1], [], []>} : vector<8x128xbf16>, vector<128x128xbf16>, vector<8x128xf32> -> vector<8x128xf32>
    %94 = vector.extract_strided_slice %93 {offsets = [0, 0], sizes = [8, 64], strides = [1, 1]} : vector<8x128xf32> to vector<8x64xf32>
    %95 = vector.extract_strided_slice %93 {offsets = [0, 64], sizes = [8, 64], strides = [1, 1]} : vector<8x128xf32> to vector<8x64xf32>
    %96 = arith.mulf %94, %94 : vector<8x64xf32>
    %97 = arith.mulf %95, %95 : vector<8x64xf32>
    %98 = arith.addf %96, %97 : vector<8x64xf32>
    %99 = math.sqrt %98 : vector<8x64xf32>
    %100 = arith.addf %17, %99 : vector<8x64xf32>
    %101 = arith.addf %100, %0 : vector<8x64xf32>
    %cst_40 = arith.constant 0.000000e+00 : f32
    %102 = vector.broadcast %cst_40 : f32 to vector<8x64xf32>
    %103 = tpu.concatenate %101, %102 in 1 : vector<8x64xf32>, vector<8x64xf32> -> vector<8x128xf32>
    %c0_41 = arith.constant 0 : index
    %c0_42 = arith.constant 0 : index
    %104 = vector.load %arg11[%c0_41, %c0_42] : memref<8x128xf32, #tpu.memory_space<vmem>>, vector<8x128xf32>
    tpu.vector_store %arg11[%c0_41, %c0_42], %103 {strides = array<i32>} : memref<8x128xf32, #tpu.memory_space<vmem>>, vector<8x128xf32>,
    return
  }
  func.func @transform_0(%arg0: i32) -> (i32, i32) {
    %c0_i32 = arith.constant 0 : i32
    %c0_i32_0 = arith.constant 0 : i32
    return %arg0, %c0_i32 : i32, i32
  }
  func.func @transform_1(%arg0: i32) -> (i32, i32) {
    %c0_i32 = arith.constant 0 : i32
    %c0_i32_0 = arith.constant 0 : i32
    %c0_i32_1 = arith.constant 0 : i32
    return %c0_i32, %c0_i32_0 : i32, i32
  }
  func.func @transform_2(%arg0: i32) -> (i32, i32) {
    %c0_i32 = arith.constant 0 : i32
    %c0_i32_0 = arith.constant 0 : i32
    %c0_i32_1 = arith.constant 0 : i32
    return %c0_i32, %c0_i32_0 : i32, i32
  }
  func.func @transform_3(%arg0: i32) -> (i32, i32) {
    %c0_i32 = arith.constant 0 : i32
    %c0_i32_0 = arith.constant 0 : i32
    %c0_i32_1 = arith.constant 0 : i32
    return %c0_i32, %c0_i32_0 : i32, i32
  }
  func.func @transform_4(%arg0: i32) -> (i32, i32) {
    %c0_i32 = arith.constant 0 : i32
    %c0_i32_0 = arith.constant 0 : i32
    %c0_i32_1 = arith.constant 0 : i32
    return %c0_i32, %c0_i32_0 : i32, i32
  }
  func.func @transform_5(%arg0: i32) -> (i32, i32) {
    %c0_i32 = arith.constant 0 : i32
    %c0_i32_0 = arith.constant 0 : i32
    %c0_i32_1 = arith.constant 0 : i32
    return %c0_i32, %c0_i32_0 : i32, i32
  }
  func.func @transform_6(%arg0: i32) -> (i32, i32) {
    %c0_i32 = arith.constant 0 : i32
    %c0_i32_0 = arith.constant 0 : i32
    %c0_i32_1 = arith.constant 0 : i32
    return %c0_i32, %c0_i32_0 : i32, i32
  }
  func.func @transform_7(%arg0: i32) -> (i32, i32) {
    %c0_i32 = arith.constant 0 : i32
    %c0_i32_0 = arith.constant 0 : i32
    %c0_i32_1 = arith.constant 0 : i32
    return %c0_i32, %c0_i32_0 : i32, i32
  }
  func.func @transform_8(%arg0: i32) -> (i32, i32) {
    %c0_i32 = arith.constant 0 : i32
    %c0_i32_0 = arith.constant 0 : i32
    %c0_i32_1 = arith.constant 0 : i32
    return %c0_i32, %c0_i32_0 : i32, i32
  }
  func.func @transform_9(%arg0: i32) -> (i32, i32) {
    %c0_i32 = arith.constant 0 : i32
    %c0_i32_0 = arith.constant 0 : i32
    %c0_i32_1 = arith.constant 0 : i32
    return %c0_i32, %c0_i32_0 : i32, i32
  }
  func.func @transform_10(%arg0: i32) -> (i32, i32) {
    %c0_i32 = arith.constant 0 : i32
    %c0_i32_0 = arith.constant 0 : i32
    return %arg0, %c0_i32 : i32, i32
  }
}

</mosaic_0001>

<bundles_post_ra>
// kernel: sff_block_forward.1
= control target key start
LH: loop header
LB: loop body
LE: loop exit
PB: predicated region body
PF: predicated region fallthrough
CT: control target
= control target key end

     0   :  { %15 = vsyncpa [#allocation3], 0  ;;  %s1714_s0 = inlined_call_operand.vmem [shape: f32[8,64], index: 0, kind: input, shape index: {}]   ;;  %s1715_s1 = inlined_call_operand.hbm [shape: bf16[64,256], index: 1, kind: input, shape index: {}]   ;;  %s1716_s2 = inlined_call_operand.hbm [shape: f32[1,256], index: 2, kind: input, shape index: {}]   ;;  %s1717_s3 = inlined_call_operand.vmem [shape: bf16[128,64], index: 3, kind: input, shape index: {}]   ;;  %s1718_s4 = inlined_call_operand.vmem [shape: f32[1,64], index: 4, kind: input, shape index: {}]   ;;  %s1719_s5 = inlined_call_operand.hbm [shape: bf16[128,256], index: 5, kind: input, shape index: {}]   ;;  %s1720_s6 = inlined_call_operand.hbm [shape: f32[1,256], index: 6, kind: input, shape index: {}]   ;;  %s1721_s7 = inlined_call_operand.vmem [shape: bf16[256,128], index: 7, kind: input, shape index: {}]   ;;  %s1722_s8 = inlined_call_operand.vmem [shape: f32[1,128], index: 8, kind: input, shape index: {}]   ;;  %s1723_s9 = inlined_call_operand.hbm [shape: bf16[128,128], index: 9, kind: input, shape index: {}]   ;;  %s1724_s10 = inlined_call_operand.vmem [shape: f32[8,128], index: 10, kind: output, shape index: {}]  }
   0x1   :  { %16 = vsyncpa [#allocation5], 0 }
   0x2   :  { %17 = vsyncpa [#allocation8], 0  ;;  %s1450_s13 = smov [#allocation4]   ;;  %s1451_s15 = smov [#allocation7]  }
   0x3   :  { %s38_s14 = sshll.u32 %s1450_s13, 4  ;;  %s64_s16 = sshll.u32 %s1451_s15, 4  ;;  %s39_s14 = int_to_ptr.vmem [resolvable:$true] %s38_s14  ;;  %s65_s16 = int_to_ptr.vmem [resolvable:$true] %s64_s16 }
   0x4   :  { %s1352_s17 = scalar_lea.vmem %s39_s14, 32  ;;  %p1357_p1 = scmp.lt.s32.totalorder %s39_s14, %s39_s14 }
   0x5   :  { %p1353_p0 = scmp.ne.s32.totalorder %s39_s14, %s1352_s17  ;;  %p1358_p2 = scmp.lt.s32.totalorder %s1352_s17, %s1352_s17 }
   0x7   :  { %p1359_p3 = por %p1358_p2, %p1357_p1 }
   0x9   :  { %p1360_p4 = pnand %p1359_p3, %p1353_p0 }
   0xb   :  { %1363 = shalt.err (!%p1360_p4)
}
   0xc   :  { %41 = dma.hbm_to_vmem [thread:$0]  %s1716_s2, 32, %s39_s14, [#allocation5]  }
   0xd   :  { %s1372_s20 = scalar_lea.vmem %s65_s16, 32  ;;  %p1377_p6 = scmp.lt.s32.totalorder %s65_s16, %s65_s16 }
   0xe   :  { %p1373_p5 = scmp.ne.s32.totalorder %s65_s16, %s1372_s20  ;;  %p1378_p7 = scmp.lt.s32.totalorder %s1372_s20, %s1372_s20 }
  0x10   :  { %p1379_p8 = por %p1378_p7, %p1377_p6 }
  0x12   :  { %p1380_p9 = pnand %p1379_p8, %p1373_p5 }
  0x14   :  { %1383 = shalt.err (!%p1380_p9)
}
  0x15   :  { %67 = dma.hbm_to_vmem [thread:$0]  %s1720_s6, 32, %s65_s16, [#allocation8]  }
  0x16   :  { %s1452_s23 = smov [#allocation2]  }
  0x17   :  { %s25_s24 = sshll.u32 %s1452_s23, 4  ;;  %s26_s24 = int_to_ptr.vmem [resolvable:$true] %s25_s24 }
  0x18   :  { %s1392_s25 = scalar_lea.vmem %s26_s24, 1024  ;;  %p1397_p11 = scmp.lt.s32.totalorder %s26_s24, %s26_s24 }
  0x19   :  { %p1393_p10 = scmp.ne.s32.totalorder %s26_s24, %s1392_s25  ;;  %p1398_p12 = scmp.lt.s32.totalorder %s1392_s25, %s1392_s25 }
  0x1b   :  { %p1399_p13 = por %p1398_p12, %p1397_p11 }
  0x1d   :  { %p1400_p0 = pnand %p1399_p13, %p1393_p10 }
  0x1f   :  { %1403 = shalt.err (!%p1400_p0)
}
  0x20   :  { %s1453_s2 = smov 128   ;;  %s1454_s26 = smov 8  }
  0x21   :  { %31 = dma.hbm_to_vmem [thread:$0]  %s1715_s1, 1024, %s26_s24, [#allocation3], %s1453_s2, %s1453_s2, %s1454_s26  }
  0x22   :  { %s1455_s29 = smov [#allocation6]   ;;  %s1456_s6 = smov [#allocation9]  }
  0x23   :  { %s51_s30 = sshll.u32 %s1455_s29, 4  ;;  %s77_s11 = sshll.u32 %s1456_s6, 4  ;;  %s52_s30 = int_to_ptr.vmem [resolvable:$true] %s51_s30  ;;  %s78_s11 = int_to_ptr.vmem [resolvable:$true] %s77_s11 }
  0x24   :  { %s1412_s12 = scalar_lea.vmem %s52_s30, 2048  ;;  %p1417_p2 = scmp.lt.s32.totalorder %s52_s30, %s52_s30 }
  0x25   :  { %p1413_p1 = scmp.ne.s32.totalorder %s52_s30, %s1412_s12  ;;  %p1418_p3 = scmp.lt.s32.totalorder %s1412_s12, %s1412_s12 }
  0x27   :  { %p1419_p4 = por %p1418_p3, %p1417_p2 }
  0x29   :  { %p1420_p5 = pnand %p1419_p4, %p1413_p1 }
  0x2b   :  { %1423 = shalt.err (!%p1420_p5)
}
  0x2c   :  { %57 = dma.hbm_to_vmem [thread:$0]  %s1719_s5, 2048, %s52_s30, [#allocation5], %s1453_s2, %s1453_s2, %s1454_s26  }
  0x2d   :  { %s1432_s15 = scalar_lea.vmem %s78_s11, 1024  ;;  %p1437_p7 = scmp.lt.s32.totalorder %s78_s11, %s78_s11 }
  0x2e   :  { %p1433_p6 = scmp.ne.s32.totalorder %s78_s11, %s1432_s15  ;;  %p1438_p8 = scmp.lt.s32.totalorder %s1432_s15, %s1432_s15 }
  0x30   :  { %p1439_p9 = por %p1438_p8, %p1437_p7 }
  0x32   :  { %p1440_p10 = pnand %p1439_p9, %p1433_p6 }
  0x34   :  { %1443 = shalt.err (!%p1440_p10)
}
  0x35   :  { %s1457_s1 = smov 64   ;;  %s1458_s16 = smov 4  }
  0x36   :  { %83 = dma.hbm_to_vmem [thread:$0]  %s1723_s9, 1024, %s78_s11, [#allocation8], %s1457_s1, %s1457_s1, %s1458_s16  }
  0x37   :  { %1444 = dma.done.wait [#allocation3], 1024  }
  0x38   :  { %1445 = vsyncadd [#allocation3], 4294966272 }
  0x39   :  { %1446 = dma.done.wait [#allocation5], 2080  }
  0x3a   :  { %1447 = vsyncadd [#allocation5], 4294965216 }
  0x3b   :  { %1448 = dma.done.wait [#allocation8], 1056  }
  0x3c   :  { %1449 = vsyncadd [#allocation8], 4294966240  ;;  %v1459_v0 = vmov 0   ;;  %v1460_v1 = vmov 0.0   ;;  %v1264_v2 = vld [vmem:[#allocation2 + $0x34] ss:$8 sps:$4 sm:$0xff]   ;;  %v112_v20 = vlaneseq }
  0x3d   :  { %198 = vmatprep.mubr.bf16.mxu0 %v1459_v0  ;;  %1192 = vmatprep.subr.bf16.mxu1 %v1460_v1  ;;  %v1266_v3 = vld [vmem:[#allocation2 + $0x30] ss:$8 sps:$4 sm:$0xff]   ;;  %v1267_v4 = vld [vmem:[#allocation2 + $0x24] ss:$8 sps:$4 sm:$0xff]   ;;  %v1269_v5 = vld [vmem:[#allocation2 + $0x20] ss:$8 sps:$4 sm:$0xff]  }
  0x3e   :  { %174 = vmatprep.subr.bf16.mxu0 %v1264_v2  ;;  %v1270_v6 = vld [vmem:[#allocation2 + $0x14] ss:$8 sps:$4 sm:$0xff]   ;;  %v1272_v7 = vld [vmem:[#allocation2 + $0x10] ss:$8 sps:$4 sm:$0xff]   ;;  %v1273_v9 = vld [vmem:[#allocation2 + $0x4] ss:$8 sps:$4 sm:$0xff]  }
  0x3f   :  { %175 = vmatpush1.bf16.msra.mxu0 %v1266_v3  ;;  %v1276_v8 = vld [vmem:[%s1717_s3 + $0x38] sm:$0xff]   ;;  %v1277_v10 = vld [vmem:[%s1717_s3 + $0x30] sm:$0xff]   ;;  %v1275_v11 = vld [vmem:[#allocation2] ss:$8 sps:$4 sm:$0xff]   ;;  %vm162_vm0 = vcmask 523264   ;;  %vm1461_vm1 = vmmov 0  }
  0x40   :  { %176 = vmatprep.subr.bf16.mxu0 %v1267_v4  ;;  %1193 = vmatpush3.bf16.msra.mxu1 %v1276_v8  ;;  %v1551_v12 = vld [vmem:[%s1714_s0] sm:$0xff]  ;;  %v1278_v13 = vld [vmem:[%s1717_s3 + $0x28] sm:$0xff]   ;;  %v1280_v16 = vld [vmem:[%s1717_s3 + $0x18] sm:$0xff]   ;;  %v1582_v21 = vshrl.u32 %v112_v20, 7 }
  0x41   :  { %1194 = vmatprep.subr.bf16.mxu1 %v1460_v1  ;;  %v101_v14 = vpack.c.bf16 %v1551_v12, %v1551_v12  ;;  %v1279_v15 = vld [vmem:[%s1717_s3 + $0x20] sm:$0xff]   ;;  %v1281_v17 = vld [vmem:[%s1717_s3 + $0x10] sm:$0xff]   ;;  %v1282_v18 = vld [vmem:[%s1717_s3 + $0x8] sm:$0xff]   ;;  %1208 = vmatprep.mubr.msk.bf16.mxu1 %vm1461_vm1, %v1460_v1 }
  0x42   :  { %v1283_v19 = vld [vmem:[%s1717_s3] sm:$0xff]   ;;  %v114_v22 = vsub.s32 0, %v1582_v21  ;;  %v118_v24 = vsub.s32 1, %v1582_v21 }
  0x43   :  { %177 = vmatpush1.bf16.msra.mxu0 %v1269_v5  ;;  %v110_v23 = vld [vmem:[#allocation4] sm:$0x3]  ;;  %v1289_v8 = vld [vmem:[#allocation6 + $0x64] ss:$8 sps:$4 sm:$0xff]  }
  0x44   :  { %178 = vmatprep.subr.bf16.mxu0 %v1270_v6  ;;  %1195 = vmatpush3.bf16.msra.mxu1 %v1277_v10  ;;  %v115_v25 = vrot.slane %v110_v23, %v114_v22  ;;  %v119_v26 = vrot.slane %v110_v23, %v118_v24  ;;  %v1284_v6 = vld [vmem:[#allocation6 + $0x70] ss:$8 sps:$4 sm:$0xff]   ;;  %v1298_v20 = vld [vmem:[#allocation6 + $0x34] ss:$8 sps:$4 sm:$0xff]  }
  0x45   :  { %1196 = vmatprep.subr.bf16.mxu1 %v1460_v1  ;;  %v1296_v23 = vld [vmem:[#allocation6 + $0x30] ss:$8 sps:$4 sm:$0xff]  }
  0x47   :  { %179 = vmatpush1.bf16.msra.mxu0 %v1272_v7  ;;  %v1286_v7 = vld [vmem:[#allocation6 + $0x74] ss:$8 sps:$4 sm:$0xff]  }
  0x48   :  { %180 = vmatprep.subr.bf16.mxu0 %v1273_v9  ;;  %1197 = vmatpush3.bf16.msra.mxu1 %v1278_v13  ;;  %v1287_v13 = vld [vmem:[#allocation6 + $0x60] ss:$8 sps:$4 sm:$0xff]  }
  0x49   :  { %1198 = vmatprep.subr.bf16.mxu1 %v1460_v1 }
  0x4b   :  { %181 = vmatpush1.bf16.msra.mxu0 %v1275_v11 }
  0x4c   :  { %1199 = vmatpush3.bf16.msra.mxu1 %v1279_v15  ;;  %511 = vmatprep.subr.bf16.mxu0 %v1286_v7  ;;  %v1292_v15 = vld [vmem:[#allocation6 + $0x54] ss:$8 sps:$4 sm:$0xff]  }
  0x4d   :  { %1200 = vmatprep.subr.bf16.mxu1 %v1460_v1 }
  0x4e   :  { %1090 = vmatmul.mubr.msk.bf16.vlgmr.msra.gmra.mxu0 %vm162_vm0, %v101_v14 }
  0x4f   :  { %543 = vmatprep.mubr.bf16.mxu0 %v1459_v0  ;;  %512 = vmatpush1.bf16.msra.mxu0 %v1284_v6 }
  0x50   :  { %1201 = vmatpush3.bf16.msra.mxu1 %v1280_v16  ;;  %513 = vmatprep.subr.bf16.mxu0 %v1289_v8 }
  0x51   :  { %1202 = vmatprep.subr.bf16.mxu1 %v1460_v1 }
  0x53   :  { %514 = vmatpush1.bf16.msra.mxu0 %v1287_v13 }
  0x54   :  { %1203 = vmatpush3.bf16.msra.mxu1 %v1281_v17  ;;  %v1290_v17 = vld [vmem:[#allocation6 + $0x50] ss:$8 sps:$4 sm:$0xff]   ;;  %515 = vmatprep.subr.bf16.mxu0 %v1292_v15 }
  0x55   :  { %1204 = vmatprep.subr.bf16.mxu1 %v1460_v1 }
  0x57   :  { %516 = vmatpush1.bf16.msra.mxu0 %v1290_v17 }
  0x58   :  { %1205 = vmatpush3.bf16.msra.mxu1 %v1282_v18  ;;  %v1295_v18 = vld [vmem:[#allocation6 + $0x44] ss:$8 sps:$4 sm:$0xff]  }
  0x59   :  { %1206 = vmatprep.subr.bf16.mxu1 %v1460_v1  ;;  %517 = vmatprep.subr.bf16.mxu0 %v1295_v18 }
  0x5c   :  { %1207 = vmatpush3.bf16.msra.mxu1 %v1283_v19  ;;  %v1293_v19 = vld [vmem:[#allocation6 + $0x40] ss:$8 sps:$4 sm:$0xff]  }
  0x5d   :  { %518 = vmatpush1.bf16.msra.mxu0 %v1293_v19 }
  0x5e   :  { %519 = vmatprep.subr.bf16.mxu0 %v1298_v20 }
  0x61   :  { %520 = vmatpush1.bf16.msra.mxu0 %v1296_v23 }
 0x10e   :  { %v200_v27 = vpop.f32.mrf.mxu0 }
 0x10f   :  { %v201_v28 = vadd.f32 %v200_v27, %v115_v25  ;;  %v1301_v25 = vld [vmem:[#allocation6 + $0x24] ss:$8 sps:$4 sm:$0xff]   ;;  %v1304_v27 = vld [vmem:[#allocation6 + $0x14] ss:$8 sps:$4 sm:$0xff]  }
 0x110   :  { %v202_v29 = vpop.f32.mrf.mxu0  ;;  %521 = vmatprep.subr.bf16.mxu0 %v1301_v25 }
 0x111   :  { %v207_v30 = vmax.f32 %v201_v28, 0.0  ;;  %v1590_v31 = vadd.f32 %v202_v29, %v119_v26  ;;  %v1299_v26 = vld [vmem:[#allocation6 + $0x20] ss:$8 sps:$4 sm:$0xff]   ;;  %v1302_v28 = vld [vmem:[#allocation6 + $0x10] ss:$8 sps:$4 sm:$0xff]  }
 0x112   :  { %v204_v32 = vpop.f32.mrf.mxu0  ;;  %522 = vmatpush1.bf16.msra.mxu0 %v1299_v26 }
 0x113   :  { %v208_v33 = vpack.c.bf16 %v207_v30, %v207_v30  ;;  %v333_v34 = vand.u32 2147483647, %v1590_v31  ;;  %v320_v5 = vmul.f32 %v1590_v31, %v1590_v31  ;;  %vm372_vm4 = vcmp.lt.f32.partialorder %v1590_v31, 0.0  ;;  %523 = vmatprep.subr.bf16.mxu0 %v1304_v27  ;;  %v1307_v32 = vld [vmem:[#allocation6 + $0x4] ss:$8 sps:$4 sm:$0xff]   ;;  %v1316_v31 = vld [vmem:[%s1721_s7 + $0x58] sm:$0xff]  }
 0x114   :  { %v205_v35 = vpop.f32.mrf.mxu0 }
 0x115   :  { %335 = vrot.lane.b32.xlu0 %v333_v34, %s1457_s1  ;;  %1209 = vmatmul.mubr.bf16.vlgmr.msra.gmra.mxu1 %v208_v33 }
 0x116   :  { %524 = vmatpush1.bf16.msra.mxu0 %v1302_v28 }
 0x117   :  { %525 = vmatprep.subr.bf16.mxu0 %v1307_v32 }
 0x187   :  { %v336_v36 = vpop.permute.xlu0 %335 }
 0x188   :  { %v338_v37 = vmax.f32 %v333_v34, %v336_v36  ;;  %v339_v39 = vmin.f32 %v333_v34, %v336_v36  ;;  %vm361_vm3 = vcmp.gt.f32.partialorder %v333_v34, %v336_v36  ;;  %v1305_v34 = vld [vmem:[#allocation6] ss:$8 sps:$4 sm:$0xff]   ;;  %v1308_v36 = vld [vmem:[%s1721_s7 + $0x78] sm:$0xff]  }
 0x189   :  { %526 = vmatpush1.bf16.msra.mxu0 %v1305_v34  ;;  %1161 = vmatprep.subr.bf16.mxu1 %v1308_v36  ;;  %v1462_v34 = vmov 683565275   ;;  %v1463_v36 = vmov 2475754826  }
 0x18a   :  { %v340_v38 = vmax.f32 %v338_v37, 1e-30  ;;  %1212 = vmatprep.subr.bf16.mxu0 %v1460_v1  ;;  %v1309_v37 = vld [vmem:[%s1721_s7 + $0x38] sm:$0xff]  }
 0x18b   :  { %1162 = vmatpush3.bf16.msra.mxu1 %v1309_v37 }
 0x18c   :  { %1332 = vrcp.f32 %v340_v38  ;;  %v1310_v38 = vld [vmem:[%s1721_s7 + $0x70] sm:$0xff]  }
 0x18d   :  { %1163 = vmatprep.subr.bf16.mxu1 %v1310_v38 }
 0x199   :  { %v1333_v40 = vpop.eup %1332 }
 0x19a   :  { %v342_v41 = vmul.f32 %v1333_v40, %v339_v39 }
 0x19c   :  { %v345_v42 = vadd.f32 1.0, %v342_v41  ;;  %v1100_v43 = vadd.f32 -1.0, %v342_v41  ;;  %vm343_vm2 = vcmp.gt.f32.partialorder %v342_v41, 0.41421357 }
 0x19d   :  { %v359_v57 = vsel %vm343_vm2, 0.7853982, %v1460_v1 }
 0x19e   :  { %1334 = vrcp.f32 %v345_v42 }
 0x1ab   :  { %v1335_v44 = vpop.eup %1334 }
 0x1ac   :  { %v347_v45 = vmul.f32 %v1335_v44, %v1100_v43  ;;  %v1311_v44 = vld [vmem:[%s1721_s7 + $0x30] sm:$0xff]  }
 0x1ad   :  { %1164 = vmatpush3.bf16.msra.mxu1 %v1311_v44 }
 0x1ae   :  { %v348_v46 = vsel %vm343_vm2, %v347_v45, %v342_v41  ;;  %v1312_v45 = vld [vmem:[%s1721_s7 + $0x68] sm:$0xff]  }
 0x1af   :  { %v349_v47 = vmul.f32 %v348_v46, %v348_v46  ;;  %1165 = vmatprep.subr.bf16.mxu1 %v1312_v45  ;;  %v1466_v45 = vmov 920167782  }
 0x1b1   :  { %v350_v48 = vmul.f32 0.080537446, %v349_v47 }
 0x1b3   :  { %v1101_v49 = vadd.f32 -0.13877685, %v350_v48 }
 0x1b5   :  { %v352_v50 = vmul.f32 %v1101_v49, %v349_v47  ;;  %v1313_v49 = vld [vmem:[%s1721_s7 + $0x28] sm:$0xff]  }
 0x1b6   :  { %1166 = vmatpush3.bf16.msra.mxu1 %v1313_v49 }
 0x1b7   :  { %v353_v51 = vadd.f32 0.19977711, %v352_v50  ;;  %v1314_v50 = vld [vmem:[%s1721_s7 + $0x60] sm:$0xff]  }
 0x1b8   :  { %1167 = vmatprep.subr.bf16.mxu1 %v1314_v50 }
 0x1b9   :  { %v354_v52 = vmul.f32 %v353_v51, %v349_v47  ;;  %v1315_v51 = vld [vmem:[%s1721_s7 + $0x20] sm:$0xff]  }
 0x1ba   :  { %1168 = vmatpush3.bf16.msra.mxu1 %v1315_v51 }
 0x1bb   :  { %v1102_v53 = vadd.f32 -0.3333295, %v354_v52  ;;  %v1317_v52 = vld [vmem:[%s1721_s7 + $0x18] sm:$0xff]   ;;  %1169 = vmatprep.subr.bf16.mxu1 %v1316_v31 }
 0x1bd   :  { %v356_v54 = vmul.f32 %v1102_v53, %v349_v47  ;;  %v1318_v53 = vld [vmem:[%s1721_s7 + $0x50] sm:$0xff]  }
 0x1be   :  { %1170 = vmatpush3.bf16.msra.mxu1 %v1317_v52 }
 0x1bf   :  { %v357_v55 = vmul.f32 %v356_v54, %v348_v46  ;;  %v1319_v54 = vld [vmem:[%s1721_s7 + $0x10] sm:$0xff]   ;;  %1171 = vmatprep.subr.bf16.mxu1 %v1318_v53 }
 0x1c1   :  { %v358_v56 = vadd.f32 %v357_v55, %v348_v46 }
 0x1c2   :  { %1172 = vmatpush3.bf16.msra.mxu1 %v1319_v54 }
 0x1c3   :  { %v360_v58 = vadd.f32 %v359_v57, %v358_v56 }
 0x1c5   :  { %368 = vrot.lane.b32.xlu1 %v360_v58, %s1457_s1  ;;  %v362_v59 = vsub.f32 1.5707964, %v360_v58 }
 0x1c7   :  { %364 = vrot.lane.b32.xlu0 %v362_v59, %s1457_s1 }
 0x1d5   :  { %v1597_v60 = vpop.f32.mrf.mxu1 }
 0x1d7   :  { %v1210_v61 = vpop.f32.mrf.mxu1 }
 0x1d8   :  { %v1320_v61 = vld [vmem:[%s1721_s7 + $0x48] sm:$0xff]  }
 0x1d9   :  { %v317_v62 = vpop.f32.mrf.mxu1  ;;  %1173 = vmatprep.subr.bf16.mxu1 %v1320_v61 }
 0x1da   :  { %v1321_v62 = vld [vmem:[%s1721_s7 + $0x8] sm:$0xff]  }
 0x1db   :  { %v1211_v63 = vpop.f32.mrf.mxu1  ;;  %1174 = vmatpush3.bf16.msra.mxu1 %v1321_v62 }
 0x1dc   :  { %v1322_v63 = vld [vmem:[%s1721_s7 + $0x40] sm:$0xff]  }
 0x1dd   :  { %1175 = vmatprep.subr.bf16.mxu1 %v1322_v63 }
 0x237   :  { %v369_v0 = vpop.permute.xlu1 %368 }
 0x239   :  { %v365_v2 = vpop.permute.xlu0 %364 }
 0x23a   :  { %v371_v3 = vsel %vm361_vm3, %v365_v2, %v369_v0  ;;  %v1323_v0 = vld [vmem:[%s1721_s7] sm:$0xff]  }
 0x23b   :  { %379 = vrot.lane.b32.xlu0 %v371_v3, %s1457_s1  ;;  %v373_v4 = vsub.f32 3.1415927, %v371_v3  ;;  %1176 = vmatpush3.bf16.msra.mxu1 %v1323_v0  ;;  %v419_v2 = vld [vmem:[#allocation7] sm:$0x3] }
 0x23c   :  { %v424_v3 = vrot.slane %v419_v2, %v114_v22  ;;  %v1119_v22 = vld [vmem:[%s1722_s8] ss:$0 sm:$0xff] }
 0x23d   :  { %375 = vrot.lane.b32.xlu1 %v373_v4, %s1457_s1  ;;  %v428_v4 = vrot.slane %v419_v2, %v118_v24 }
 0x241   :  { %322 = vrot.lane.b32.xlu1 %v320_v5, %s1457_s1 }
 0x2ad   :  { %v380_v9 = vpop.permute.xlu0 %379 }
 0x2af   :  { %v376_v10 = vpop.permute.xlu1 %375 }
 0x2b0   :  { %v382_v11 = vsel %vm372_vm4, %v376_v10, %v380_v9 }
 0x2b1   :  { %v383_v14 = vsub.f32 0.0, %v382_v11 }
 0x2b3   :  { %v1254_v16 = vpack.i.bf16 %v382_v11, %v383_v14  ;;  %v323_v29 = vpop.permute.xlu1 %322 }
 0x2b4   :  { %v325_v30 = vadd.f32 %v323_v29, %v320_v5 }
 0x2b5   :  { %1255 = vrot.lane.b32.xlu0 %v1254_v16, %s1457_s1 }
 0x2b6   :  { %1336 = vrsqrt.f32 %v325_v30  ;;  %vm328_vm5 = vcmp.eq.f32.partialorder %v325_v30, inf  ;;  %v331_v43 = vand.u32 2147483648, %v325_v30  ;;  %vm330_vm6 = vcmp.eq.f32.partialorder %v325_v30, 0.0 }
 0x2c3   :  { %v1337_v33 = vpop.eup %1336 }
 0x2c4   :  { %v327_v35 = vmul.f32 %v1337_v33, %v325_v30 }
 0x2c6   :  { %v329_v40 = vsel %vm328_vm5, %v325_v30, %v327_v35 }
 0x2c7   :  { %v332_v46 = vsel %vm330_vm6, %v331_v43, %v329_v40 }
 0x327   :  { %v1256_v39 = vpop.permute.xlu0 %1255 }
 0x328   :  { %v1258_v41 = vunpack.i.h.bf16 %v1256_v39  ;;  %v1257_v42 = vunpack.i.l.bf16 %v1256_v39  ;;  %v1464_v39 = vmov 2131351028  }
 0x32a   :  { %v392_v47 = vsel %vm372_vm4, %v1257_v42, %v1258_v41  ;;  %v1465_v42 = vmov 2102212464  }
 0x32b   :  { %v1259_v48 = vpack.i.bf16 %v332_v46, %v392_v47 }
 0x32d   :  { %1260 = vrot.lane.b32.xlu1 %v1259_v48, %s1457_s1  ;;  %v1467_v48 = vmov 1326507024  }
 0x39f   :  { %v1261_v55 = vpop.permute.xlu1 %1260 }
 0x3a0   :  { %v1263_v56 = vunpack.i.h.bf16 %v1261_v55  ;;  %v1262_v57 = vunpack.i.l.bf16 %v1261_v55 }
 0x3a2   :  { %v401_v58 = vsel %vm162_vm0, %v1262_v57, %v1263_v56 }
 0x3a3   :  { %v402_v59 = vpack.c.bf16 %v401_v58, %v401_v58 }
 0x3a5   :  { %544 = vmatmul.mubr.bf16.vlgmr.msra.gmra.mxu0 %v402_v59 }
 0x3a6   :  { %1228 = vmatprep.mubr.msk.bf16.mxu0 %vm1461_vm1, %v1460_v1 }
 0x465   :  { %v545_v5 = vpop.f32.mrf.mxu0 }
 0x466   :  { %v546_v6 = vadd.f32 %v545_v5, %v424_v3 }
 0x467   :  { %v547_v7 = vpop.f32.mrf.mxu0 }
 0x468   :  { %v548_v8 = vadd.f32 %v547_v7, %v428_v4  ;;  %v552_v9 = vmax.f32 %v546_v6, 0.0 }
 0x469   :  { %v549_v10 = vpop.f32.mrf.mxu0 }
 0x46a   :  { %v553_v11 = vmax.f32 %v548_v8, 0.0  ;;  %v554_v15 = vpack.c.bf16 %v552_v9, %v552_v9 }
 0x46b   :  { %v550_v13 = vpop.f32.mrf.mxu0 }
 0x46c   :  { %v555_v14 = vpack.c.bf16 %v553_v11, %v553_v11 }
 0x46e   :  { %723 = vmatprep.mubr.bf16.mxu1 %v555_v14 }
 0x46f   :  { %724 = vmatmul.mubr.bf16.vlgmr.msra.gmra.mxu1 %v554_v15 }
 0x52f   :  { %v1177_v16 = vpop.f32.mrf.mxu1 }
 0x531   :  { %v1178_v17 = vpop.f32.mrf.mxu1 }
 0x532   :  { %v1179_v21 = vadd.f32 %v1178_v17, %v1177_v16 }
 0x533   :  { %v1180_v24 = vpop.f32.mrf.mxu1 }
 0x534   :  { %v1670_v18 = vadd.f32 %v1179_v21, %v1119_v22 }
 0x535   :  { %v1181_v19 = vpop.f32.mrf.mxu1 }
 0x536   :  { %v734_v20 = vand.u32 2139095040, %v1670_v18  ;;  %v731_v27 = vand.u32 2147483647, %v1670_v18  ;;  %vm733_vm14 = vcmp.lt.s32.totalorder %v1670_v18, 0 }
 0x538   :  { %v735_v23 = vshrl.u32 %v734_v20, 23  ;;  %v738_v30 = vand.u32 8388607, %v731_v27  ;;  %vm732_vm15 = vcmp.le.f32.partialorder %v731_v27, 0.7853982  ;;  %v1326_v27 = vld [vmem:[#allocation9 + $0x28] sm:$0xff]  }
 0x53a   :  { %v1136_v25 = vadd.s32 4294967169, %v735_v23  ;;  %v739_v50 = vor.u32 8388608, %v738_v30 }
 0x53c   :  { %v741_v26 = vadd.s32 1, %v1136_v25  ;;  %v779_v0 = vshll.u32 %v739_v50, 8  ;;  %v1325_v50 = vld [vmem:[#allocation9 + $0x30] sm:$0xff]  }
 0x53e   :  { %vm742_vm7 = vcmp.gt.s32.totalorder %v741_v26, 0 }
 0x53f   :  { %v743_v28 = vsel %vm742_vm7, %v741_v26, 0  ;;  %vm823_vm7 = vweird.f32 %v1670_v18 }
 0x540   :  { %v745_v29 = vand.u32 31, %v743_v28  ;;  %v744_v33 = vshrl.u32 %v743_v28, 5 }
 0x542   :  { %v746_v32 = vsub.s32 32, %v745_v29  ;;  %v748_v35 = vshll.u32 %v1462_v34, %v745_v29  ;;  %v751_v37 = vshll.u32 %v1463_v36, %v745_v29  ;;  %v754_v41 = vshll.u32 %v1464_v39, %v745_v29 }
 0x543   :  { %v757_v44 = vshll.u32 %v1465_v42, %v745_v29  ;;  %v760_v47 = vshll.u32 %v1466_v45, %v745_v29  ;;  %vm763_vm8 = vcmp.lt.s32.totalorder %v744_v33, 1  ;;  %vm766_vm9 = vcmp.lt.s32.totalorder %v744_v33, 4 }
 0x544   :  { %v749_v38 = vshrl.u32 %v1463_v36, %v746_v32  ;;  %v752_v40 = vshrl.u32 %v1464_v39, %v746_v32  ;;  %v755_v43 = vshrl.u32 %v1465_v42, %v746_v32  ;;  %v758_v46 = vshrl.u32 %v1466_v45, %v746_v32 }
 0x545   :  { %v761_v49 = vshrl.u32 %v1467_v48, %v746_v32  ;;  %v747_v58 = vshrl.u32 %v1462_v34, %v746_v32  ;;  %vm765_vm10 = vcmp.lt.s32.totalorder %v744_v33, 3  ;;  %vm764_vm11 = vcmp.lt.s32.totalorder %v744_v33, 2 }
 0x546   :  { %v750_v51 = vor.u32 %v749_v38, %v748_v35  ;;  %v753_v31 = vor.u32 %v752_v40, %v751_v37  ;;  %v756_v52 = vor.u32 %v755_v43, %v754_v41  ;;  %v759_v53 = vor.u32 %v758_v46, %v757_v44 }
 0x547   :  { %v762_v54 = vor.u32 %v761_v49, %v760_v47  ;;  %v1324_v47 = vld [vmem:[#allocation9 + $0x38] sm:$0xff]  }
 0x548   :  { %v768_v55 = vsel %vm766_vm9, %v756_v52, 2102212464  ;;  %v771_v56 = vsel %vm763_vm8, %v750_v51, %v753_v31  ;;  %v775_v57 = vsel %vm763_vm8, %v753_v31, %v756_v52  ;;  %v772_v59 = vsel %vm766_vm9, %v759_v53, 920167782  ;;  %1213 = vmatpush3.bf16.msra.mxu0 %v1324_v47 }
 0x549   :  { %v776_v61 = vsel %vm766_vm9, %v762_v54, 1326507024  ;;  %v773_v62 = vsel %vm765_vm10, %v756_v52, %v772_v59  ;;  %v767_v2 = vsel %vm763_vm8, %v747_v58, %v750_v51  ;;  %v769_v3 = vsel %vm765_vm10, %v753_v31, %v768_v55  ;;  %1214 = vmatprep.subr.bf16.mxu0 %v1460_v1 }
 0x54a   :  { %v777_v63 = vsel %vm765_vm10, %v759_v53, %v776_v61  ;;  %v774_v4 = vsel %vm764_vm11, %v771_v56, %v773_v62  ;;  %v770_v10 = vsel %vm764_vm11, %v767_v2, %v769_v3  ;;  %v1329_v2 = vld [vmem:[#allocation9 + $0x10] sm:$0xff]   ;;  %v1330_v3 = vld [vmem:[#allocation9 + $0x8] sm:$0xff]  }
 0x54b   :  { %v778_v5 = vsel %vm764_vm11, %v775_v57, %v777_v63  ;;  %v1679_v8 = vmul.u32.u64.low %v779_v0, %v774_v4  ;;  %v1680_v9 = vmul.u32.u64.high %v779_v0, %v774_v4, %v1679_v8  ;;  %v786_v13 = vmul.u32 %v779_v0, %v770_v10  ;;  %v1327_v63 = vld [vmem:[#allocation9 + $0x20] sm:$0xff]  }
 0x54c   :  { %v1676_v6 = vmul.u32.u64.low %v779_v0, %v778_v5  ;;  %v1677_v7 = vmul.u32.u64.high %v779_v0, %v778_v5, %v1676_v6  ;;  %1215 = vmatpush3.bf16.msra.mxu0 %v1325_v50  ;;  %v1328_v0 = vld [vmem:[#allocation9 + $0x18] sm:$0xff]   ;;  %v1331_v4 = vld [vmem:[#allocation9] sm:$0xff]  }
 0x54d   :  { %v789_v11 = vadd.s32 1, %v1680_v9  ;;  %1216 = vmatprep.subr.bf16.mxu0 %v1460_v1 }
 0x54e   :  { %vm788_vm12 = vc.u32 %v1677_v7, %v1679_v8  ;;  %v787_v26 = vadd.s32 %v1679_v8, %v1677_v7 }
 0x54f   :  { %v790_v14 = vsel %vm788_vm12, %v789_v11, %v1680_v9 }
 0x550   :  { %v791_v15 = vadd.s32 %v790_v14, %v786_v13  ;;  %1217 = vmatpush3.bf16.msra.mxu0 %v1326_v27 }
 0x551   :  { %1218 = vmatprep.subr.bf16.mxu0 %v1460_v1 }
 0x552   :  { %v792_v16 = vadd.s32 536870912, %v791_v15 }
 0x554   :  { %v793_v22 = vshrl.u32 %v792_v16, 30  ;;  %1219 = vmatpush3.bf16.msra.mxu0 %v1327_v63 }
 0x555   :  { %1220 = vmatprep.subr.bf16.mxu0 %v1460_v1 }
 0x556   :  { %v794_v17 = vshll.u32 %v793_v22, 30  ;;  %v817_v41 = vsub.s32 4, %v793_v22 }
 0x558   :  { %v795_v21 = vsub.s32 %v791_v15, %v794_v17  ;;  %v818_v44 = vsel %vm733_vm14, %v817_v41, %v793_v22  ;;  %1221 = vmatpush3.bf16.msra.mxu0 %v1328_v0 }
 0x559   :  { %v820_v45 = vsel %vm732_vm15, 0, %v818_v44  ;;  %1222 = vmatprep.subr.bf16.mxu0 %v1460_v1 }
 0x55a   :  { %v797_v24 = vsub.s32 0, %v795_v21  ;;  %v932_v46 = vadd.s32 3, %v820_v45  ;;  %v824_v49 = vand.u32 3, %v820_v45 }
 0x55c   :  { %v1137_v19 = vmin.u32 %v797_v24, %v795_v21  ;;  %v933_v48 = vand.u32 3, %v932_v46  ;;  %vm829_vm2 = vcmp.eq.s32.totalorder %v824_v49, 2  ;;  %vm826_vm4 = vcmp.eq.s32.totalorder %v824_v49, 0  ;;  %1223 = vmatpush3.bf16.msra.mxu0 %v1329_v2 }
 0x55d   :  { %vm825_vm6 = vcmp.lt.s32.totalorder %v824_v49, 2  ;;  %1224 = vmatprep.subr.bf16.mxu0 %v1460_v1 }
 0x55e   :  { %v799_v20 = vclz %v1137_v19  ;;  %vm938_vm1 = vcmp.eq.s32.totalorder %v933_v48, 2  ;;  %vm935_vm3 = vcmp.eq.s32.totalorder %v933_v48, 0  ;;  %vm934_vm5 = vcmp.lt.s32.totalorder %v933_v48, 2 }
 0x560   :  { %v1138_v23 = vadd.s32 4294967294, %v799_v20  ;;  %1225 = vmatpush3.bf16.msra.mxu0 %v1330_v3 }
 0x561   :  { %1226 = vmatprep.subr.bf16.mxu0 %v1460_v1 }
 0x562   :  { %vm1139_vm13 = vcmp.lt.s32.totalorder %v1138_v23, 0 }
 0x563   :  { %v802_v25 = vsel %vm1139_vm13, 0, %v1138_v23 }
 0x564   :  { %v803_v28 = vsub.s32 32, %v802_v25  ;;  %v807_v29 = vsub.s32 4294967266, %v802_v25  ;;  %v804_v30 = vshll.u32 %v795_v21, %v802_v25  ;;  %1227 = vmatpush3.bf16.msra.mxu0 %v1331_v4 }
 0x566   :  { %v805_v32 = vshrl.u32 %v787_v26, %v803_v28  ;;  %v808_v33 = vadd.s32 127, %v807_v29 }
 0x568   :  { %v806_v34 = vor.u32 %v805_v32, %v804_v30  ;;  %v809_v35 = vshll.u32 %v808_v33, 23 }
 0x56a   :  { %v810_v36 = vor.u32 4788187, %v809_v35  ;;  %v813_v38 = vcvt.s32.f32 %v806_v34 }
 0x56c   :  { %v811_v37 = vand.u32 2147483647, %v810_v36 }
 0x56e   :  { %v814_v39 = vmul.f32 %v813_v38, %v811_v37 }
 0x570   :  { %v815_v40 = vxor.u32 2147483648, %v814_v39 }
 0x572   :  { %v816_v42 = vsel %vm733_vm14, %v815_v40, %v814_v39 }
 0x573   :  { %v819_v43 = vsel %vm732_vm15, %v1670_v18, %v816_v42 }
 0x574   :  { %1338 = vcosq.f32 %v819_v43 }
 0x575   :  { %1340 = vsinq.f32 %v819_v43 }
 0x581   :  { %v1339_v51 = vpop.eup %1338 }
 0x582   :  { %v1341_v31 = vpop.eup %1340  ;;  %v830_v52 = vxor.u32 2147483648, %v1339_v51 }
 0x583   :  { %v827_v53 = vxor.u32 2147483648, %v1341_v31 }
 0x584   :  { %v940_v54 = vsel %vm938_vm1, %v830_v52, %v1341_v31  ;;  %v831_v55 = vsel %vm829_vm2, %v830_v52, %v1341_v31 }
 0x585   :  { %v937_v56 = vsel %vm935_vm3, %v1339_v51, %v827_v53  ;;  %v828_v57 = vsel %vm826_vm4, %v1339_v51, %v827_v53 }
 0x586   :  { %v941_v58 = vsel %vm934_vm5, %v937_v56, %v940_v54  ;;  %v832_v59 = vsel %vm825_vm6, %v828_v57, %v831_v55 }
 0x587   :  { %v942_v61 = vsel %vm823_vm7, nan, %v941_v58  ;;  %v833_v62 = vsel %vm823_vm7, nan, %v832_v59 }
 0x588   :  { %944 = vrot.lane.b32.xlu1 %v942_v61, %s1457_s1  ;;  %835 = vrot.lane.b32.xlu0 %v833_v62, %s1457_s1 }
 0x5fa   :  { %v836_v5 = vpop.permute.xlu0 %835  ;;  %v945_v7 = vpop.permute.xlu1 %944 }
 0x5fb   :  { %v838_v6 = vmul.f32 %v836_v5, %v1670_v18  ;;  %v947_v8 = vmul.f32 %v945_v7, %v1670_v18  ;;  %v1091_v18 = vld [vmem:[%s1718_s4] ss:$0 sm:$0xff] }
 0x5fc   :  { %v315_v20 = vadd.f32 %v1091_v18, %v1597_v60 }
 0x5fd   :  { %949 = vrot.lane.b32.xlu0 %v838_v6, %s1457_s1 }
 0x66f   :  { %v950_v9 = vpop.permute.xlu0 %949 }
 0x670   :  { %v952_v10 = vsel %vm162_vm0, %v950_v9, %v947_v8 }
 0x671   :  { %v953_v11 = vpack.c.bf16 %v952_v10, %v952_v10 }
 0x673   :  { %1229 = vmatmul.mubr.bf16.vlgmr.msra.gmra.mxu0 %v953_v11 }
 0x733   :  { %v1052_v13 = vpop.f32.mrf.mxu0 }
 0x734   :  { %v1058_v14 = vmul.f32 %v1052_v13, %v1052_v13 }
 0x735   :  { %v1230_v15 = vpop.f32.mrf.mxu0 }
 0x736   :  { %1060 = vrot.lane.b32.xlu1 %v1058_v14, %s1457_s1 }
 0x737   :  { %v1055_v1 = vpop.f32.mrf.mxu0 }
 0x739   :  { %v1231_v16 = vpop.f32.mrf.mxu0 }
 0x7a8   :  { %v1061_v22 = vpop.permute.xlu1 %1060 }
 0x7a9   :  { %v1063_v17 = vadd.f32 %v1061_v22, %v1058_v14 }
 0x7ab   :  { %1342 = vrsqrt.f32 %v1063_v17  ;;  %vm1066_vm8 = vcmp.eq.f32.partialorder %v1063_v17, inf  ;;  %v1069_v19 = vand.u32 2147483648, %v1063_v17  ;;  %vm1068_vm9 = vcmp.eq.f32.partialorder %v1063_v17, 0.0 }
 0x7b8   :  { %v1343_v21 = vpop.eup %1342 }
 0x7b9   :  { %v1065_v24 = vmul.f32 %v1343_v21, %v1063_v17 }
 0x7bb   :  { %v1067_v23 = vsel %vm1066_vm8, %v1063_v17, %v1065_v24 }
 0x7bc   :  { %v1070_v25 = vsel %vm1068_vm9, %v1069_v19, %v1067_v23 }
 0x7bd   :  { %v1071_v26 = vadd.f32 %v1070_v25, %v315_v20 }
 0x7bf   :  { %v1072_v28 = vadd.f32 %v1071_v26, %v1551_v12 }
 0x7c1   :  { %v1073_v29 = vsel %vm162_vm0, %v1072_v28, 0.0 }
 0x7c2   :  { %1074 = vst [vmem:[%s1724_s10] sm:$0xff] %v1073_v29 }
 0x7c3   :  { %1079 = vsyncpa [#allocation3], 1 }
 0x7c4   :  { %1080 = vsyncpa [#allocation5], 1 }
 0x7c5   :  { %1081 = vsyncpa [#allocation8], 1 }

</bundles_post_ra>
